<compile_context>
chip_gen: v6e
topology: v6e:2x2x1
jax: 0.10.0
libtpu: 0.0.40
codegen_flags: <defaults>
</compile_context>

<pallas_src>
import functools

import jax
import jax.numpy as jnp
from jax import lax
from jax.experimental import pallas as pl
from jax.experimental.pallas import tpu as pltpu


def _tpu_target():
    """Best-effort query: (TensorCores per device, VMEM bytes per core)."""
    kind = ""
    try:
        kind = (getattr(jax.devices()[0], "device_kind", "") or "").lower()
    except Exception:
        pass
    vmem_cap = None
    try:
        info_fn = getattr(pltpu, "get_tpu_info", None)
        if info_fn is not None:
            vmem_cap = int(info_fn().vmem_capacity_bytes)
    except Exception:
        vmem_cap = None
    if vmem_cap is None:
        vmem_cap = (64 << 20) if "v7" in kind else (128 << 20)
    # v7x (and v4/v5p megacore) expose 2 TensorCores behind one device; the
    # leading 'parallel' grid axis shards across them.  v5e/v6e have a single
    # TC, where a chunk split is just a serial loop with extra overhead.
    num_cores = 2 if (("v7" in kind) or ("v4" in kind) or ("v5p" in kind)) else 1
    return num_cores, vmem_cap


def _soft_ce_kernel(pred_ref, tgt_ref, out_ref, acc_ref, *,
                    total_rows, tile_n, steps_per_chunk, never_needs_mask):
    ci = pl.program_id(0)   # chunk axis ('parallel': sharded across TCs when >1)
    si = pl.program_id(1)   # sequential reduction axis

    @pl.when(si == 0)
    def _():
        acc_ref[...] = jnp.zeros_like(acc_ref)

    x = pred_ref[...].astype(jnp.float32)   # (tile_n, C)
    t = tgt_ref[...].astype(jnp.float32)    # (tile_n, C)

    # Numerically stable log-softmax, folded:
    #   ce_row = sum_c(t) * lse - sum_c(t * (x - m))
    m = jnp.max(x, axis=-1, keepdims=True)
    z = x - m
    lse = jnp.log(jnp.sum(jnp.exp(z), axis=-1, keepdims=True))
    t_sum = jnp.sum(t, axis=-1, keepdims=True)
    tz_sum = jnp.sum(t * z, axis=-1, keepdims=True)
    ce = t_sum * lse - tz_sum               # (tile_n, 1) per-row CE

    if never_needs_mask:
        # Tiling divides the row count exactly and there are no redundant
        # trailing blocks: no mask work on any step.
        acc_ref[...] += jnp.sum(ce).reshape(1, 1)
    else:
        row0 = (ci * steps_per_chunk + si) * tile_n
        needs_mask = row0 + tile_n > total_rows

        @pl.when(jnp.logical_not(needs_mask))
        def _():
            acc_ref[...] += jnp.sum(ce).reshape(1, 1)

        @pl.when(needs_mask)
        def _():
            # Out-of-range rows of a partial trailing block hold unspecified
            # data, so `ce` may be NaN/Inf there; we rely on select semantics
            # (jnp.where never propagates the unselected operand).  Fully
            # redundant trailing blocks re-read a valid (clamped) block and
            # are masked entirely.
            rows = row0 + lax.broadcasted_iota(jnp.int32, ce.shape, 0)
            acc_ref[...] += jnp.sum(
                jnp.where(rows < total_rows, ce, 0.0)).reshape(1, 1)

    # One per-chunk scalar write in the epilogue.
    @pl.when(si == pl.num_programs(1) - 1)
    def _():
        out_ref[...] = jnp.sum(acc_ref[...]).reshape(1, 1, 1)


def soft_target_cross_entropy_loss(pred, target, reduction="mean"):
    """Pallas implementation of SoftTargetCrossEntropyLoss.forward.

    pred, target: same shape (..., C), any leading rank, any dtype.
    Returns a float32 scalar for reduction in {'mean', 'sum'}.
    """
    if reduction == "none":
        # TODO(synk): 'none' reduction (per-row output) not wired into the Pallas path.
        raise NotImplementedError("reduction='none' not implemented in the Pallas kernel")
    if reduction not in ("mean", "sum"):
        raise ValueError(f"{reduction} is not a valid value for reduction")

    c = pred.shape[-1]
    pred2 = pred.reshape(-1, c)
    tgt2 = target.reshape(-1, c)
    n = pred2.shape[0]

    itemsize = max(jnp.dtype(pred2.dtype).itemsize, jnp.dtype(tgt2.dtype).itemsize)
    pack = max(8, 32 // itemsize)          # sublane packing: 8 f32, 16 bf16, 32 int8/fp8
    c_pad = -(-c // 128) * 128
    row_bytes = c_pad * itemsize

    num_cores, vmem_cap = _tpu_target()

    # Per-generation input budget (2 inputs x 2 pipeline buffers must fit):
    # conservative on v7x (64 MiB physical VMEM), roomier on v5e/v6e (128 MiB).
    budget = (24 << 20) if vmem_cap <= (64 << 20) else (48 << 20)

    # Bytes-per-block tile cap (replaces the old fixed 1024-row cap): target
    # multi-MiB blocks so the ~0.35 us per-grid-step overhead is amortised and
    # DMA runs near the HBM roofline, even for small class counts.
    blk_cap_bytes = min(budget // 4, 8 << 20)
    max_tile = max(pack, (blk_cap_bytes // row_bytes) // pack * pack)
    if n <= pack:
        tile_n = n                          # block equals full row dim (always legal)
    else:
        tile_n = min(max_tile, (n // pack) * pack)

    steps_total = -(-n // tile_n)
    # Split rows across TensorCores only on multi-TC devices (v7x / megacore),
    # and only when the split wastes little (otherwise a redundant, fully
    # masked trailing block would be pure wasted HBM traffic).
    if num_cores > 1 and steps_total >= 2 and (
            steps_total % num_cores == 0 or steps_total >= 4 * num_cores):
        num_chunks = num_cores
    else:
        num_chunks = 1
    steps_per_chunk = -(-steps_total // num_chunks)
    last_block = steps_total - 1
    never_mask = (num_chunks * steps_per_chunk == steps_total) and \
                 (steps_total * tile_n == n)

    def row_block(ci, si):
        # Clamp so trailing (fully masked) grid steps re-read a valid block.
        return jnp.minimum(ci * steps_per_chunk + si, last_block)

    kernel = functools.partial(
        _soft_ce_kernel,
        total_rows=n, tile_n=tile_n, steps_per_chunk=steps_per_chunk,
        never_needs_mask=never_mask,
    )

    # VMEM limit derived from the actual block bytes (2 inputs x 2 pipeline
    # buffers + small margin), clamped to leave headroom on each generation.
    tile_pad = -(-tile_n // pack) * pack
    in_bytes = 2 * 2 * tile_pad * row_bytes
    vmem_limit = int(min(max(in_bytes + (2 << 20), 32 << 20),
                         max(vmem_cap - (16 << 20), 32 << 20)))

    # NOTE(v7x): the leading 'parallel' axis is how Pallas shards grid steps
    # across the 2 TensorCores; if a future profile shows both cores are not
    # engaged, switch this axis to pltpu.CORE_PARALLEL / pl.core_map.
    partials = pl.pallas_call(
        kernel,
        out_shape=jax.ShapeDtypeStruct((num_chunks, 1, 1), jnp.float32),
        grid_spec=pltpu.PrefetchScalarGridSpec(
            num_scalar_prefetch=0,
            grid=(num_chunks, steps_per_chunk),
            in_specs=[
                pl.BlockSpec((tile_n, c), lambda ci, si: (row_block(ci, si), 0)),
                pl.BlockSpec((tile_n, c), lambda ci, si: (row_block(ci, si), 0)),
            ],
            out_specs=pl.BlockSpec((1, 1, 1), lambda ci, si: (ci, 0, 0)),
            scratch_shapes=[pltpu.VMEM((1, 1), jnp.float32)],
        ),
        compiler_params=pltpu.CompilerParams(
            dimension_semantics=("parallel", "arbitrary"),
            vmem_limit_bytes=vmem_limit,
        ),
    )(pred2, tgt2)

    total = jnp.sum(partials)
    if reduction == "mean":
        return total / jnp.float32(n)
    return total


def _reference(pred, target, reduction="mean"):
    logp = jax.nn.log_softmax(pred.astype(jnp.float32), axis=-1)
    ce = jnp.sum(-target.astype(jnp.float32) * logp, axis=-1)
    return ce.mean() if reduction == "mean" else ce.sum()


if __name__ == "__main__":
    key = jax.random.PRNGKey(0)
    k1, k2, k3, k4 = jax.random.split(key, 4)

    # Test 1/2: arbitrary rank, row count not a multiple of 8, C not a
    # multiple of 128 (exercises masking + lane-padded reductions), f32.
    shape = (2, 7, 100)   # -> 14 rows, 100 classes
    pred = jax.random.normal(k1, shape, dtype=jnp.float32)
    target = jax.nn.softmax(jax.random.normal(k2, shape, dtype=jnp.float32), axis=-1)

    loss_mean = jax.block_until_ready(soft_target_cross_entropy_loss(pred, target, "mean"))
    loss_sum = jax.block_until_ready(soft_target_cross_entropy_loss(pred, target, "sum"))
    ref_mean = _reference(pred, target, "mean")
    ref_sum = _reference(pred, target, "sum")
    assert jnp.allclose(loss_mean, ref_mean, rtol=1e-5, atol=1e-4), (loss_mean, ref_mean)
    assert jnp.allclose(loss_sum, ref_sum, rtol=1e-5, atol=1e-4), (loss_sum, ref_sum)

    # Test 3: bf16 inputs (native dtype fed to the kernel; upcast in-kernel),
    # exact tiling (no masking path).
    shape_b = (4, 8, 128)  # -> 32 rows (multiple of 16 for bf16 packing)
    pred_b = jax.random.normal(k3, shape_b, dtype=jnp.bfloat16)
    target_b = jax.nn.softmax(
        jax.random.normal(k4, shape_b, dtype=jnp.float32), axis=-1
    ).astype(jnp.bfloat16)
    loss_b = jax.block_until_ready(soft_target_cross_entropy_loss(pred_b, target_b, "mean"))
    ref_b = _reference(pred_b, target_b, "mean")
    assert jnp.allclose(loss_b, ref_b, rtol=1e-5, atol=1e-4), (loss_b, ref_b)

    print("KERNEL_OK")
</pallas_src>

<mosaic_0001>
module attributes {stable_mosaic.version = 11 : i64} {
  func.func @_soft_ce_kernel(%arg0: i32, %arg1: i32, %arg2: memref<8x100xf32, #tpu.memory_space<vmem>>, %arg3: memref<8x100xf32, #tpu.memory_space<vmem>>, %arg4: memref<1x1x1xf32, #tpu.memory_space<vmem>>, %arg5: memref<1x1xf32, #tpu.memory_space<vmem>>) attributes {dimension_semantics = [#tpu.dimension_semantics<parallel>, #tpu.dimension_semantics<arbitrary>], iteration_bounds = array<i64: 1, 2>, scalar_prefetch = 0 : i64, scratch_operands = 1 : i64, tpu.core_type = #tpu.core_type<tc>, window_params = [{transform_indices = @transform_0, window_bounds = array<i64: 8, 100>}, {transform_indices = @transform_1, window_bounds = array<i64: 8, 100>}, {transform_indices = @transform_2, window_bounds = array<i64: 1, 1, 1>}]} {
    %c0_i32 = arith.constant 0 : i32
    %0 = arith.cmpi eq, %arg1, %c0_i32 : i32
    %1 = arith.extui %0 : i1 to i32
    %c0_i32_0 = arith.constant 0 : i32
    %2 = arith.cmpi ne, %1, %c0_i32_0 : i32
    scf.if %2 {
      %cst_11 = arith.constant 0.000000e+00 : f32
      %33 = vector.broadcast %cst_11 : f32 to vector<1x1xf32>
      %c0_12 = arith.constant 0 : index
      %c0_13 = arith.constant 0 : index
      %34 = vector.load %arg5[%c0_12, %c0_13] : memref<1x1xf32, #tpu.memory_space<vmem>>, vector<1x1xf32>
      tpu.vector_store %arg5[%c0_12, %c0_13], %33 {strides = array<i32>} : memref<1x1xf32, #tpu.memory_space<vmem>>, vector<1x1xf32>,
    } else {
    }
    %c0 = arith.constant 0 : index
    %c0_1 = arith.constant 0 : index
    %3 = vector.load %arg2[%c0, %c0_1] : memref<8x100xf32, #tpu.memory_space<vmem>>, vector<8x100xf32>
    %c0_2 = arith.constant 0 : index
    %c0_3 = arith.constant 0 : index
    %4 = vector.load %arg3[%c0_2, %c0_3] : memref<8x100xf32, #tpu.memory_space<vmem>>, vector<8x100xf32>
    %cst = arith.constant dense<0xFF800000> : vector<8xf32>
    %5 = vector.multi_reduction <maximumf>, %3, %cst [1] : vector<8x100xf32> to vector<8xf32>
    %6 = vector.shape_cast %5 : vector<8xf32> to vector<8x1xf32>
    %7 = vector.broadcast %6 : vector<8x1xf32> to vector<8x100xf32>
    %8 = arith.subf %3, %7 : vector<8x100xf32>
    %9 = math.exp %8 : vector<8x100xf32>
    %cst_4 = arith.constant dense<0.000000e+00> : vector<8xf32>
    %10 = vector.multi_reduction <add>, %9, %cst_4 [1] : vector<8x100xf32> to vector<8xf32>
    %11 = vector.shape_cast %10 : vector<8xf32> to vector<8x1xf32>
    %12 = math.log %11 : vector<8x1xf32>
    %cst_5 = arith.constant dense<0.000000e+00> : vector<8xf32>
    %13 = vector.multi_reduction <add>, %4, %cst_5 [1] : vector<8x100xf32> to vector<8xf32>
    %14 = vector.shape_cast %13 : vector<8xf32> to vector<8x1xf32>
    %15 = arith.mulf %4, %8 : vector<8x100xf32>
    %cst_6 = arith.constant dense<0.000000e+00> : vector<8xf32>
    %16 = vector.multi_reduction <add>, %15, %cst_6 [1] : vector<8x100xf32> to vector<8xf32>
    %17 = vector.shape_cast %16 : vector<8xf32> to vector<8x1xf32>
    %18 = arith.mulf %14, %12 : vector<8x1xf32>
    %19 = arith.subf %18, %17 : vector<8x1xf32>
    %c2_i32 = arith.constant 2 : i32
    %20 = arith.muli %arg0, %c2_i32 : i32
    %21 = arith.addi %20, %arg1 : i32
    %c8_i32 = arith.constant 8 : i32
    %22 = arith.muli %21, %c8_i32 : i32
    %c8_i32_7 = arith.constant 8 : i32
    %23 = arith.addi %22, %c8_i32_7 : i32
    %c14_i32 = arith.constant 14 : i32
    %24 = arith.cmpi sgt, %23, %c14_i32 : i32
    %true = arith.constant true
    %25 = arith.xori %24, %true : i1
    %26 = arith.extui %25 : i1 to i32
    %c0_i32_8 = arith.constant 0 : i32
    %27 = arith.cmpi ne, %26, %c0_i32_8 : i32
    scf.if %27 {
      %c0_11 = arith.constant 0 : index
      %c0_12 = arith.constant 0 : index
      %33 = vector.load %arg5[%c0_11, %c0_12] : memref<1x1xf32, #tpu.memory_space<vmem>>, vector<1x1xf32>
      %34 = vector.shape_cast %19 : vector<8x1xf32> to vector<1x8x1xf32>
      %cst_13 = arith.constant dense<0.000000e+00> : vector<1xf32>
      %35 = vector.multi_reduction <add>, %34, %cst_13 [1, 2] : vector<1x8x1xf32> to vector<1xf32>
      %36 = vector.shape_cast %35 : vector<1xf32> to vector<1x1x1xf32>
      %37 = vector.extract %36[0, 0, 0] : f32 from vector<1x1x1xf32>
      %38 = vector.broadcast %37 : f32 to vector<1x1xf32>
      %39 = arith.addf %33, %38 : vector<1x1xf32>
      %c0_14 = arith.constant 0 : index
      %c0_15 = arith.constant 0 : index
      %40 = vector.load %arg5[%c0_14, %c0_15] : memref<1x1xf32, #tpu.memory_space<vmem>>, vector<1x1xf32>
      tpu.vector_store %arg5[%c0_14, %c0_15], %39 {strides = array<i32>} : memref<1x1xf32, #tpu.memory_space<vmem>>, vector<1x1xf32>,
    } else {
    }
    %28 = arith.extui %24 : i1 to i32
    %c0_i32_9 = arith.constant 0 : i32
    %29 = arith.cmpi ne, %28, %c0_i32_9 : i32
    scf.if %29 {
      %33 = tpu.iota {dimensions = array<i32: 0>} : vector<8x1xi32>
      %34 = vector.broadcast %22 : i32 to vector<8x1xi32>
      %35 = arith.addi %34, %33 : vector<8x1xi32>
      %c0_11 = arith.constant 0 : index
      %c0_12 = arith.constant 0 : index
      %36 = vector.load %arg5[%c0_11, %c0_12] : memref<1x1xf32, #tpu.memory_space<vmem>>, vector<1x1xf32>
      %c14_i32_13 = arith.constant 14 : i32
      %37 = vector.broadcast %c14_i32_13 : i32 to vector<8x1xi32>
      %38 = arith.cmpi slt, %35, %37 : vector<8x1xi32>
      %cst_14 = arith.constant 0.000000e+00 : f32
      %39 = vector.broadcast %cst_14 : f32 to vector<8x1xf32>
      %40 = arith.select %38, %19, %39 : vector<8x1xi1>, vector<8x1xf32>
      %41 = vector.shape_cast %40 : vector<8x1xf32> to vector<1x8x1xf32>
      %cst_15 = arith.constant dense<0.000000e+00> : vector<1xf32>
      %42 = vector.multi_reduction <add>, %41, %cst_15 [1, 2] : vector<1x8x1xf32> to vector<1xf32>
      %43 = vector.shape_cast %42 : vector<1xf32> to vector<1x1x1xf32>
      %44 = vector.extract %43[0, 0, 0] : f32 from vector<1x1x1xf32>
      %45 = vector.broadcast %44 : f32 to vector<1x1xf32>
      %46 = arith.addf %36, %45 : vector<1x1xf32>
      %c0_16 = arith.constant 0 : index
      %c0_17 = arith.constant 0 : index
      %47 = vector.load %arg5[%c0_16, %c0_17] : memref<1x1xf32, #tpu.memory_space<vmem>>, vector<1x1xf32>
      tpu.vector_store %arg5[%c0_16, %c0_17], %46 {strides = array<i32>} : memref<1x1xf32, #tpu.memory_space<vmem>>, vector<1x1xf32>,
    } else {
    }
    %c1_i32 = arith.constant 1 : i32
    %30 = arith.cmpi eq, %arg1, %c1_i32 : i32
    %31 = arith.extui %30 : i1 to i32
    %c0_i32_10 = arith.constant 0 : i32
    %32 = arith.cmpi ne, %31, %c0_i32_10 : i32
    scf.if %32 {
      %c0_11 = arith.constant 0 : index
      %c0_12 = arith.constant 0 : index
      %33 = vector.load %arg5[%c0_11, %c0_12] : memref<1x1xf32, #tpu.memory_space<vmem>>, vector<1x1xf32>
      %34 = vector.shape_cast %33 : vector<1x1xf32> to vector<1x1x1xf32>
      %cst_13 = arith.constant dense<0.000000e+00> : vector<1xf32>
      %35 = vector.multi_reduction <add>, %34, %cst_13 [1, 2] : vector<1x1x1xf32> to vector<1xf32>
      %36 = vector.shape_cast %35 : vector<1xf32> to vector<1x1x1xf32>
      %37 = vector.extract %36[0, 0, 0] : f32 from vector<1x1x1xf32>
      %38 = vector.broadcast %37 : f32 to vector<1x1x1xf32>
      %c0_14 = arith.constant 0 : index
      %c0_15 = arith.constant 0 : index
      %c0_16 = arith.constant 0 : index
      %39 = vector.load %arg4[%c0_14, %c0_15, %c0_16] : memref<1x1x1xf32, #tpu.memory_space<vmem>>, vector<1x1x1xf32>
      tpu.vector_store %arg4[%c0_14, %c0_15, %c0_16], %38 {strides = array<i32>} : memref<1x1x1xf32, #tpu.memory_space<vmem>>, vector<1x1x1xf32>,
    } else {
    }
    return
  }
  func.func @transform_0(%arg0: i32, %arg1: i32) -> (i32, i32) {
    %c2_i32 = arith.constant 2 : i32
    %0 = arith.muli %arg0, %c2_i32 : i32
    %1 = arith.addi %0, %arg1 : i32
    %c1_i32 = arith.constant 1 : i32
    %2 = arith.minsi %1, %c1_i32 : i32
    %c0_i32 = arith.constant 0 : i32
    %c0_i32_0 = arith.constant 0 : i32
    return %2, %c0_i32 : i32, i32
  }
  func.func @transform_1(%arg0: i32, %arg1: i32) -> (i32, i32) {
    %c2_i32 = arith.constant 2 : i32
    %0 = arith.muli %arg0, %c2_i32 : i32
    %1 = arith.addi %0, %arg1 : i32
    %c1_i32 = arith.constant 1 : i32
    %2 = arith.minsi %1, %c1_i32 : i32
    %c0_i32 = arith.constant 0 : i32
    %c0_i32_0 = arith.constant 0 : i32
    return %2, %c0_i32 : i32, i32
  }
  func.func @transform_2(%arg0: i32, %arg1: i32) -> (i32, i32, i32) {
    %c0_i32 = arith.constant 0 : i32
    %c0_i32_0 = arith.constant 0 : i32
    %c0_i32_1 = arith.constant 0 : i32
    return %arg0, %c0_i32, %c0_i32_0 : i32, i32, i32
  }
}

</mosaic_0001>

<bundles_post_ra>
// kernel: tpu_custom_call.1
= control target key start
LH: loop header
LB: loop body
LE: loop exit
PB: predicated region body
PF: predicated region fallthrough
CT: control target
= control target key end

     0   :  { %7 = vsyncpa [#allocation4], 0  ;;  %s821_s0 = inlined_call_operand.hbm [shape: f32[14,100], index: 0, kind: input, shape index: {}]   ;;  %s822_s1 = inlined_call_operand.hbm [shape: f32[14,100], index: 1, kind: input, shape index: {}]   ;;  %s823_s2 = inlined_call_operand.hbm [shape: f32[1,1,1], index: 2, kind: output, shape index: {}]  }
   0x1   :  { %9 = vsyncpa [#allocation4 + $0x1], 0 }
   0x2   :  { %10 = vsyncpa [#allocation7], 0 }
   0x3   :  { %12 = vsyncpa [#allocation7 + $0x1], 0 }
   0x4   :  { %13 = vsyncpa [#allocation5], 0  ;;  %s671_s9 = smov 0   ;;  %s673_s10 = smov 0  }
   0x5   :  { %s675_s11 = smov 0   ;;  %s677_s12 = smov 0  }
   0x6   :  { %s679_s13 = smov 0   ;;  %s681_s14 = smov 0  }
   0x7 LB: > { %s415_s15 = sadd.s32 4294967295, %s650_s14   ;;  %s28_s16 = sadd.s32 1, %s646_s13  ;;  %s650_s14 = sphi %s681_s14, %s19_s14   ;;  %s646_s13 = sphi %s679_s13, %s832_s13   ;;  %s642_s12 = sphi %s677_s12, %s831_s12   ;;  %s638_s11 = sphi %s675_s11, %s830_s11   ;;  %s634_s10 = sphi %s673_s10, %s829_s10   ;;  %s630_s9 = sphi %s671_s9, %s828_s9  }
   0x8   : > { %p29_p0 = scmp.ge.s32.totalorder %s28_s16, 2  ;;  %p37_p1 = scmp.lt.s32.totalorder %s646_s13, 1 }
   0x9   : > { %s46_s17 = sadd.s32 1, %s638_s11  ;;  %p53_p2 = scmp.ne.s32.totalorder %s638_s11, %s634_s10 }
   0xa   : > { %s834_s16 = smov (%p29_p0, %s28_s16), 0  ;;  %p54_p4 = scmp.eq.s32.totalorder %s650_s14, 0 }
   0xb   : > { %s708_s18 = scalar_select %p37_p1, %s646_s13, 1 }
   0xc   : > { %p41_p3 = scmp.lt.s32.totalorder %s834_s16, 1  ;;  %p59_p5 = scmp.ne.s32.totalorder %s634_s10, %s630_s9 }
   0xd   : > { %p60_p6 = scmp.eq.s32.totalorder %s415_s15, 0  ;;  %p55_p7 = por %p54_p4, %p53_p2 }
   0xe   : > { %s42_s19 = scalar_select %p41_p3, %s834_s16, 1 }
   0xf   : > { %p716_p8 = por %p60_p6, %p59_p5  ;;  %p455_p10 = scmp.lt.s32.totalorder %s650_s14, 2 }
  0x10   : > { %s43_s21 = ssub.s32 %s708_s18, %s42_s19  ;;  %s723_s22 = sand.u32 1, %s638_s11  }
  0x11   : > { %p44_p9 = scmp.eq.s32.totalorder %s43_s21, 0  ;;  %s419_s23 = sshll.u32 %s708_s18, 7 }
  0x12   : > { %s418_s25 = sshll.u32 %s723_s22, 3  ;;  %s156_s28 = scalar_lea.hbm %s821_s0, %s419_s23 }
  0x13   : > { %s727_s24 = scalar_select %p44_p9, %s638_s11, %s46_s17  }
  0x14   : > { %s147_s29 = scalar_lea.vmem [#allocation3], %s418_s25  ;;  %p733_p11 = pnand %p455_p10, %p55_p7 }
  0x15   : > { %s158_s30 = sshll.u32 %s147_s29, 4  ;;  %p422_p12 = scmp.ge.s32.totalorder %s650_s14, 1  ;;  %s159_s30 = int_to_ptr.vmem [resolvable:$true] %s158_s30 }
  0x16   : > { %p185_p13 = scmp.lt.s32.totalorder %s650_s14, 3  ;;  %s144_s4 = scalar_lea.sflag [#allocation4], %s723_s22 }
  0x17   : > { %p514_p0 = pneg %p733_p11  ;;  %s525_s5 = scalar_lea.vmem %s159_s30, 128 }
  0x18   : > { %p526_p1 = scmp.ne.s32.totalorder %s159_s30, %s525_s5  ;;  %s652_s6 = smov [#allocation3]  }
  0x19   : > { %s530_s7 = sshll.u32 %s652_s6, 4  ;;  %s531_s7 = int_to_ptr.vmem [resolvable:$false] %s530_s7 }
  0x1a   : > { %p528_p2 = pnand %p526_p1, %p514_p0  ;;  %s532_s8 = scalar_lea.vmem %s531_s7, 256 }
  0x1b   : > { %p533_p4 = scmp.lt.s32.totalorder %s159_s30, %s531_s7  ;;  %p534_p5 = scmp.lt.s32.totalorder %s532_s8, %s525_s5 }
  0x1c   : > { %p529_p3 = pneg %p528_p2 }
  0x1d   : > { %p535_p6 = por %p534_p5, %p533_p4 }
  0x1f   : > { %p536_p7 = pnand %p535_p6, %p529_p3 }
  0x21   : > { %539 = shalt.err (!%p536_p7)
}
  0x22   : > { %451 = dma.hbm_to_vmem [thread:$0]  (!%p733_p11), %s156_s28, 128, %s159_s30, %s144_s4  }
  0x23   : > { %p751_p9 = pnand %p422_p12, %p185_p13  ;;  %s178_s19 = scalar_lea.hbm %s822_s1, %s419_s23 }
  0x24   : > { %s169_s21 = scalar_lea.vmem [#allocation6], %s418_s25  ;;  %s166_s27 = scalar_lea.sflag [#allocation7], %s723_s22 }
  0x25   : > { %s180_s26 = sshll.u32 %s169_s21, 4  ;;  %s653_s28 = smov [#allocation6]   ;;  %s181_s26 = int_to_ptr.vmem [resolvable:$true] %s180_s26 }
  0x26   : > { %s553_s29 = scalar_lea.vmem %s181_s26, 128  ;;  %s558_s30 = sshll.u32 %s653_s28, 4  ;;  %s559_s30 = int_to_ptr.vmem [resolvable:$false] %s558_s30 }
  0x27   : > { %p554_p10 = scmp.ne.s32.totalorder %s181_s26, %s553_s29  ;;  %s560_s4 = scalar_lea.vmem %s559_s30, 256 }
  0x28   : > { %p561_p12 = scmp.lt.s32.totalorder %s181_s26, %s559_s30  ;;  %p562_p13 = scmp.lt.s32.totalorder %s560_s4, %s553_s29 }
  0x29   : > { %p556_p1 = pnand %p554_p10, %p514_p0 }
  0x2a   : > { %p563_p3 = por %p562_p13, %p561_p12 }
  0x2b   : > { %p557_p2 = pneg %p556_p1 }
  0x2d   : > { %p564_p4 = pnand %p563_p3, %p557_p2 }
  0x2f   : > { %567 = shalt.err (!%p564_p4)
}
  0x30   : > { %454 = dma.hbm_to_vmem [thread:$0]  (!%p733_p11), %s178_s19, 128, %s181_s26, %s166_s27  }
  0x31   : > { %189 = sbr.rel (%p751_p9) target bundleno = 883 (0x373), region = 28  ;;  %s191_s22 = sand.u32 (!%p751_p9), 1, %s634_s10  }
  0x32   : > { %s423_s23 = sshll.u32 (!%p751_p9), %s191_s22, 3  ;;  %s192_s25 = scalar_lea.sflag (!%p751_p9), [#allocation4], %s191_s22 }
  0x33   : > { %s195_s5 = scalar_lea.vmem (!%p751_p9), [#allocation3], %s423_s23 }
  0x36   : > { %617 = dma.done.wait (%p716_p8), %s192_s25, 128  }
  0x37   : > { %619 = vsyncadd (%p716_p8), %s192_s25, 4294967168  ;;  %s201_s6 = scalar_lea.sflag [#allocation7], %s191_s22  ;;  %s204_s7 = scalar_lea.vmem [#allocation6], %s423_s23 }
  0x38   : > { %621 = dma.done.wait (%p716_p8), %s201_s6, 128  }
  0x39   : > { %623 = vsyncadd (%p716_p8), %s201_s6, 4294967168  ;;  %p425_p11 = scmp.ne.s32.totalorder %s642_s12, 0 }
  0x3b   : > { %236 = sbr.rel (%p425_p11) target bundleno = 66 (0x42), region = 40 }
  0x40   : > { %vm237_vm0 = vcmask 0   ;;  %v654_v0 = vmov 0.0  }
  0x41   : > { %238 = vst.msk [vmem:[#allocation2] sm:$0x1] %vm237_vm0, %v654_v0 }
  0x42 PF: > { %v239_v1 = vld [vmem:[%s195_s5] sm:$0xff]  ;;  %vm241_vm1 = vcmask 818176   ;;  %v240_v3 = vld [vmem:[%s204_s7] sm:$0xff]  ;;  %s426_s20 = sshll.u32 %s642_s12, 3 }
  0x43   : > { %v242_v2 = vsel %vm241_vm1, %v239_v1, -inf  ;;  %v253_v4 = vsel %vm241_vm1, %v240_v3, 0.0  ;;  %s779_s3 = sadd.s32 8, %s426_s20 }
  0x44   : > { %243 = vmax.xlane.f32.xlu0 %v242_v2  ;;  %254 = vadd.xlane.f32.xlu1 %v253_v4  ;;  %p427_p8 = scmp.gt.s32.totalorder %s779_s3, 14 }
  0xcd   : > { %v244_v5 = vpop.xlane.xlu0 %243  ;;  %v255_v13 = vpop.xlane.xlu1 %254 }
  0xce   : > { %v245_v6 = vsub.f32 %v239_v1, %v244_v5 }
  0xd0   : > { %v246_v7 = vmul.f32 1.442695, %v245_v6  ;;  %v256_v8 = vmul.f32 %v245_v6, %v240_v3 }
  0xd2   : > { %508 = vpow2.f32 %v246_v7  ;;  %v257_v9 = vsel %vm241_vm1, %v256_v8, 0.0 }
  0xd3   : > { %258 = vadd.xlane.f32.xlu1 %v257_v9 }
  0xdf   : > { %v509_v10 = vpop.eup %508 }
  0xe0   : > { %v248_v11 = vsel %vm241_vm1, %v509_v10, 0.0 }
  0xe1   : > { %249 = vadd.xlane.f32.xlu0 %v248_v11 }
 0x15c   : > { %v259_v17 = vpop.xlane.xlu1 %258 }
 0x16a   : > { %v250_v12 = vpop.xlane.xlu0 %249 }
 0x16b   : > { %510 = vlog2.f32 %v250_v12 }
 0x178   : > { %v511_v14 = vpop.eup %510 }
 0x179   : > { %v252_v15 = vmul.f32 0.6931472, %v511_v14  ;;  %270 = sbr.rel (%p427_p8) target bundleno = 588 (0x24c), region = 44 }
 0x17b   : > { %v260_v16 = vmul.f32 %v255_v13, %v252_v15 }
 0x17d   : > { %v261_v18 = vsub.f32 %v260_v16, %v259_v17 }
 0x17e   : > { %vm272_vm2 = vcmask 7168   ;;  %v271_v27 = vld [vmem:[#allocation2] sm:$0x1]  ;;  %vm285_vm3 = vcmask 0  }
 0x17f   : > { %v273_v19 = vsel %vm272_vm2, %v261_v18, 0.0 }
 0x180   : > { %274 = vadd.xlane.f32.xlu0 %v273_v19 }
 0x209   : > { %v275_v20 = vpop.xlane.xlu0 %274 }
 0x20a   : > { %v276_v21 = vrot.slane %v275_v20, 4 }
 0x20c   : > { %v277_v22 = vadd.f32 %v276_v21, %v275_v20 }
 0x20e   : > { %v278_v23 = vrot.slane %v277_v22, 2 }
 0x210   : > { %v279_v24 = vadd.f32 %v278_v23, %v277_v22 }
 0x212   : > { %v280_v25 = vrot.slane %v279_v24, 1 }
 0x214   : > { %v281_v26 = vadd.f32 %v280_v25, %v279_v24 }
 0x216   : > { %434 = vpush %v281_v26 }
 0x247   : > { %s435_s8 = spop %434 }
 0x248   : > { %v283_v28 = vstv %s435_s8 }
 0x249   : > { %v284_v29 = vadd.f32 %v283_v28, %v271_v27 }
 0x24b   : > { %286 = vst.msk [vmem:[#allocation2] sm:$0x1] %vm285_vm3, %v284_v29 }
 0x24c PF: > { %p428_p0 = scmp.le.s32.totalorder %s779_s3, 14 }
 0x24e   : > { %289 = sbr.rel (%p428_p0) target bundleno = 808 (0x328), region = 48 }
 0x253   : > { %v290_v30 = vlaneseq  ;;  %v292_v31 = vstv %s426_s20  ;;  %vm297_vm4 = vcmask 7168   ;;  %v294_v43 = vld [vmem:[#allocation2] sm:$0x1]  ;;  %vm310_vm6 = vcmask 0  }
 0x255   : > { %v291_v32 = vshrl.u32 %v290_v30, 7 }
 0x257   : > { %v293_v33 = vadd.s32 %v292_v31, %v291_v32 }
 0x259   : > { %vm295_vm5 = vcmp.lt.s32.totalorder %v293_v33, 14 }
 0x25a   : > { %v296_v34 = vsel %vm295_vm5, %v261_v18, 0.0 }
 0x25b   : > { %v298_v35 = vsel %vm297_vm4, %v296_v34, 0.0 }
 0x25c   : > { %299 = vadd.xlane.f32.xlu0 %v298_v35 }
 0x2e5   : > { %v300_v36 = vpop.xlane.xlu0 %299 }
 0x2e6   : > { %v301_v37 = vrot.slane %v300_v36, 4 }
 0x2e8   : > { %v302_v38 = vadd.f32 %v301_v37, %v300_v36 }
 0x2ea   : > { %v303_v39 = vrot.slane %v302_v38, 2 }
 0x2ec   : > { %v304_v40 = vadd.f32 %v303_v39, %v302_v38 }
 0x2ee   : > { %v305_v41 = vrot.slane %v304_v40, 1 }
 0x2f0   : > { %v306_v42 = vadd.f32 %v305_v41, %v304_v40 }
 0x2f2   : > { %436 = vpush %v306_v42 }
 0x323   : > { %s437_s9 = spop %436 }
 0x324   : > { %v308_v44 = vstv %s437_s9 }
 0x325   : > { %v309_v45 = vadd.f32 %v308_v44, %v294_v43 }
 0x327   : > { %311 = vst.msk [vmem:[#allocation2] sm:$0x1] %vm310_vm6, %v309_v45 }
 0x328 PF: > { %p429_p5 = scmp.ne.s32.totalorder %s642_s12, 1 }
 0x32a   : > { %315 = sbr.rel (%p429_p5) target bundleno = 868 (0x364), region = 52 }
 0x32f   : > { %v316_v46 = vld [vmem:[#allocation2] sm:$0x1]  ;;  %vm320_vm7 = vcmask 0  }
 0x330   : > { %438 = vpush %v316_v46 }
 0x361   : > { %s439_s17 = spop %438 }
 0x362   : > { %v319_v47 = vstv %s439_s17 }
 0x363   : > { %321 = vst.msk [vmem:[#allocation8] sm:$0x1] %vm320_vm7, %v319_v47 }
 0x364 PF: > { %p788_p6 = scmp.eq.s32.totalorder %s415_s15, 1  ;;  %s655_s19 = smov [#allocation8]  }
 0x365   : > { %s331_s21 = sshll.u32 %s655_s19, 4  ;;  %s332_s21 = int_to_ptr.vmem [resolvable:$true] %s331_s21 }
 0x366   : > { %s568_s26 = scalar_lea.vmem %s332_s21, 16  ;;  %s574_s12 = scalar_lea.vmem %s332_s21, 32 }
 0x367   : > { %p569_p7 = scmp.ne.s32.totalorder %s332_s21, %s568_s26  ;;  %p575_p1 = scmp.lt.s32.totalorder %s332_s21, %s332_s21 }
 0x368   : > { %p576_p2 = scmp.lt.s32.totalorder %s574_s12, %s568_s26 }
 0x369   : > { %p570_p9 = pnand %p569_p7, %p788_p6 }
 0x36a   : > { %p577_p12 = por %p576_p2, %p575_p1 }
 0x36b   : > { %p571_p10 = pneg %p570_p9 }
 0x36d   : > { %p578_p13 = pnand %p577_p12, %p571_p10 }
 0x36f   : > { %581 = shalt.err (!%p578_p13)
}
 0x370   : > { %445 = dma.vmem_to_hbm [thread:$0]  (%p788_p6), %s332_s21, 16, %s823_s2, [#allocation5]  }
 0x371   : > { %625 = dma.done.wait (%p788_p6), [#allocation5], 16  }
 0x372   : > { %627 = vsyncadd (%p788_p6), [#allocation5], 4294967280 }
 0x373 PF: > { %s19_s14 = sadd.s32 1, %s650_s14   ;;  %s828_s9 = smov %s634_s10 }
 0x374   : > { %p16_p3 = scmp.ge.s32.totalorder %s19_s14, 4   ;;  %s829_s10 = smov %s638_s11 }
 0x375   : > { %s830_s11 = smov %s727_s24  ;;  %s831_s12 = smov %s646_s13 }
 0x376   : > { %s832_s13 = smov %s834_s16  ;;  %18 = sbr.rel (!%p16_p3) target bundleno = 7 (0x7), region = 95 }
 0x37b   :  { %344 = vsyncpa [#allocation4], 1 }
 0x37c   :  { %346 = vsyncpa [#allocation4 + $0x1], 1 }
 0x37d   :  { %347 = vsyncpa [#allocation7], 1 }
 0x37e   :  { %349 = vsyncpa [#allocation7 + $0x1], 1 }
 0x37f   :  { %350 = vsyncpa [#allocation5], 1 }
 0x380   :  { %352 = vsyncpa [#allocation5 + $0x1], 1 }

</bundles_post_ra>
